<compile_context>
chip_gen: v6e
topology: v6e:2x2x1
jax: 0.10.0
libtpu: 0.0.40
codegen_flags: <defaults>
</compile_context>

<pallas_src>
import jax
import jax.numpy as jnp
from jax.experimental import pallas as pl
from jax.experimental.pallas import tpu as pltpu

# ----------------------------- configuration --------------------------------
B = 8                # batch
C, H, W = 4, 16, 16  # NCHW input image
D_IN = C * H * W     # flattened featurizer input dim
FEAT = 32            # in_features produced by the featurizer
NR_ATTR = 2          # nr_attr_values


# ------------------------------ Pallas kernel --------------------------------
def fair_classifier_kernel(x_ref, wf_ref, bf_ref, wh_ref, bh_ref,
                           d_ref, dt_ref, out_ref):
    # featurizer: cast x to bf16 in-kernel (VPU op, hides under the MXU),
    # (B, D_IN)bf16 @ (D_IN, FEAT)bf16 -> f32 accumulate, + bias, ReLU
    x_bf16 = x_ref[...].astype(jnp.bfloat16)
    feats = jnp.dot(x_bf16, wf_ref[...],
                    preferred_element_type=jnp.float32) + bf_ref[...]
    feats = jnp.maximum(feats, 0.0)

    # fused heads: [group_0 .. group_{NR_ATTR-1}, joint] in one matmul
    # (B, FEAT) @ (FEAT, NR_ATTR+1) -> (B, NR_ATTR+1), single sigmoid
    logits = jnp.dot(feats, wh_ref[...],
                     preferred_element_type=jnp.float32) + bh_ref[...]
    probs = jax.nn.sigmoid(logits)

    joint = probs[:, NR_ATTR:NR_ATTR + 1]      # (B, 1) joint classifier sigmoid
    d_col = d_ref[...]                         # (B, 1) int32 true attribute
    dt_col = dt_ref[...]                       # (B, 1) int32 random attribute

    # per-sample head selection (== PyTorch argsort/split/scatter grouping)
    if NR_ATTR == 2:
        # direct VPU select: no cross-lane (XLU) reductions in the epilogue
        p0 = probs[:, 0:1]
        p1 = probs[:, 1:2]
        grp = jnp.where(d_col == 0, p0, p1)
        agn = jnp.where(dt_col == 0, p0, p1)
    else:
        grp_probs = probs[:, :NR_ATTR]
        attr_iota = jax.lax.broadcasted_iota(jnp.int32, grp_probs.shape, 1)
        grp = jnp.sum(jnp.where(attr_iota == d_col, grp_probs, 0.0),
                      axis=-1, keepdims=True)
        agn = jnp.sum(jnp.where(attr_iota == dt_col, grp_probs, 0.0),
                      axis=-1, keepdims=True)

    # single lane-packed output block: col0=joint, col1=group-specific, col2=agnostic
    col_iota = jax.lax.broadcasted_iota(jnp.int32, out_ref.shape, 1)
    out_ref[...] = jnp.where(col_iota == 0, joint,
                             jnp.where(col_iota == 1, grp, agn))


# ------------------------------ JAX wrapper ----------------------------------
@jax.jit
def fair_classifier_forward(x, d, d_tilde, params):
    """Returns (joint_pred, group_specific_pred, group_agnostic_pred), each (B,)."""
    b = x.shape[0]
    # f32 flatten only (metadata reshape); bf16 cast happens inside the kernel
    x_flat = x.reshape(b, -1)
    # attribute selectors as two (B, 1) int32 columns (metadata reshape only)
    d_col = d.astype(jnp.int32)[:, None]
    dt_col = d_tilde.astype(jnp.int32)[:, None]

    wf = params["w_feat_bf16"]    # pre-cast in init_params (no per-call cast)
    bf = params["b_feat"]
    wh = params["w_heads"]        # pre-packed [group heads | joint] weight
    bh = params["b_heads"]

    nheads = NR_ATTR + 1
    cost = pl.CostEstimate(
        flops=2 * b * D_IN * FEAT + 2 * b * FEAT * nheads,
        transcendentals=b * nheads,                  # sigmoid exps
        bytes_accessed=(x_flat.size * 4 + wf.size * 2 + bf.size * 4
                        + wh.size * 4 + bh.size * 4
                        + 2 * b * 4 + b * 3 * 4),
    )

    vmem = pl.BlockSpec(memory_space=pltpu.MemorySpace.VMEM)
    out = pl.pallas_call(
        fair_classifier_kernel,
        out_shape=jax.ShapeDtypeStruct((b, 3), jnp.float32),
        in_specs=[vmem] * 7,
        out_specs=vmem,
        cost_estimate=cost,
    )(x_flat, wf, bf, wh, bh, d_col, dt_col)

    # PyTorch applies .squeeze() to every prediction -> shape (B,)
    return out[:, 0], out[:, 1], out[:, 2]


# --------------------------- deterministic params ----------------------------
def init_params(key):
    """Mimic nn.Linear default init: U(-1/sqrt(fan_in), 1/sqrt(fan_in)).

    All kernel-facing prep (bf16 cast of the featurizer weight, packing the
    group heads + joint head into one weight/bias) happens here, once, so the
    forward path carries no per-call parameter ops.
    """
    ks = jax.random.split(key, 6)

    def lin(kw, kb, fan_in, fan_out):
        bound = 1.0 / jnp.sqrt(fan_in)
        w = jax.random.uniform(kw, (fan_in, fan_out), jnp.float32, -bound, bound)
        b = jax.random.uniform(kb, (1, fan_out), jnp.float32, -bound, bound)
        return w, b

    w_feat, b_feat = lin(ks[0], ks[1], D_IN, FEAT)
    # the nr_attr_values group-specific Linear(FEAT, 1) heads, stacked columnwise
    w_grp, b_grp = lin(ks[2], ks[3], FEAT, NR_ATTR)
    w_joint, b_joint = lin(ks[4], ks[5], FEAT, 1)

    return {
        # f32 originals (reference / training-side use)
        "w_feat": w_feat, "b_feat": b_feat,
        "w_grp": w_grp, "b_grp": b_grp,
        "w_joint": w_joint, "b_joint": b_joint,
        # kernel-ready, prepped once
        "w_feat_bf16": w_feat.astype(jnp.bfloat16),
        "w_heads": jnp.concatenate([w_grp, w_joint], axis=1),
        "b_heads": jnp.concatenate([b_grp, b_joint], axis=1),
    }


# --------------------------------- main ---------------------------------------
if __name__ == "__main__":
    key = jax.random.PRNGKey(0)
    k_x, k_d, k_dt, k_p = jax.random.split(key, 4)

    x = jax.random.normal(k_x, (B, C, H, W), jnp.float32)        # NCHW input
    d = jax.random.randint(k_d, (B,), 0, NR_ATTR)                # true attrs
    d_tilde = jax.random.randint(k_dt, (B,), 0, NR_ATTR)         # random attrs
    params = init_params(k_p)

    joint_pred, grp_pred, agn_pred = fair_classifier_forward(x, d, d_tilde, params)
    jax.block_until_ready((joint_pred, grp_pred, agn_pred))

    # pure-JAX f32 reference (kernel uses bf16 featurizer matmul -> loose atol)
    xf = x.reshape(B, -1)
    feats = jnp.maximum(xf @ params["w_feat"] + params["b_feat"], 0.0)
    g = feats @ params["w_grp"] + params["b_grp"]
    ref_joint = jax.nn.sigmoid(feats @ params["w_joint"] + params["b_joint"])[:, 0]
    ref_grp = jax.nn.sigmoid(g[jnp.arange(B), d])
    ref_agn = jax.nn.sigmoid(g[jnp.arange(B), d_tilde])
    assert jnp.allclose(joint_pred, ref_joint, atol=2e-2)
    assert jnp.allclose(grp_pred, ref_grp, atol=2e-2)
    assert jnp.allclose(agn_pred, ref_agn, atol=2e-2)

    print("KERNEL_OK")
</pallas_src>

<mosaic_0001>
module attributes {stable_mosaic.version = 11 : i64} {
  func.func @fair_classifier_kernel(%arg0: memref<8x1024xf32, #tpu.memory_space<vmem>>, %arg1: memref<1024x32xbf16, #tpu.memory_space<vmem>>, %arg2: memref<1x32xf32, #tpu.memory_space<vmem>>, %arg3: memref<32x3xf32, #tpu.memory_space<vmem>>, %arg4: memref<1x3xf32, #tpu.memory_space<vmem>>, %arg5: memref<8x1xi32, #tpu.memory_space<vmem>>, %arg6: memref<8x1xi32, #tpu.memory_space<vmem>>, %arg7: memref<8x3xf32, #tpu.memory_space<vmem>>) attributes {dimension_semantics = [], scalar_prefetch = 0 : i64, scratch_operands = 0 : i64, tpu.core_type = #tpu.core_type<tc>} {
    %c0 = arith.constant 0 : index
    %c0_0 = arith.constant 0 : index
    %0 = vector.load %arg0[%c0, %c0_0] : memref<8x1024xf32, #tpu.memory_space<vmem>>, vector<8x1024xf32>
    %1 = arith.truncf %0 : vector<8x1024xf32> to vector<8x1024xbf16>
    %c0_1 = arith.constant 0 : index
    %c0_2 = arith.constant 0 : index
    %2 = vector.load %arg1[%c0_1, %c0_2] : memref<1024x32xbf16, #tpu.memory_space<vmem>>, vector<1024x32xbf16>
    %cst = arith.constant dense<0.000000e+00> : vector<8x32xf32>
    %3 = tpu.matmul %1, %2, %cst {dimension_numbers = #tpu.dot_dimension_numbers<[1], [0], [0], [1], [0, 0, 1, 1], [], []>} : vector<8x1024xbf16>, vector<1024x32xbf16>, vector<8x32xf32> -> vector<8x32xf32>
    %c0_3 = arith.constant 0 : index
    %c0_4 = arith.constant 0 : index
    %4 = vector.load %arg2[%c0_3, %c0_4] : memref<1x32xf32, #tpu.memory_space<vmem>>, vector<1x32xf32>
    %5 = vector.broadcast %4 : vector<1x32xf32> to vector<8x32xf32>
    %6 = arith.addf %3, %5 : vector<8x32xf32>
    %cst_5 = arith.constant 0.000000e+00 : f32
    %7 = vector.broadcast %cst_5 : f32 to vector<8x32xf32>
    %8 = arith.maximumf %6, %7 : vector<8x32xf32>
    %c0_6 = arith.constant 0 : index
    %c0_7 = arith.constant 0 : index
    %9 = vector.load %arg3[%c0_6, %c0_7] : memref<32x3xf32, #tpu.memory_space<vmem>>, vector<32x3xf32>
    %cst_8 = arith.constant dense<0.000000e+00> : vector<8x3xf32>
    %10 = tpu.matmul %8, %9, %cst_8 {dimension_numbers = #tpu.dot_dimension_numbers<[1], [0], [0], [1], [0, 0, 1, 1], [], []>} : vector<8x32xf32>, vector<32x3xf32>, vector<8x3xf32> -> vector<8x3xf32>
    %c0_9 = arith.constant 0 : index
    %c0_10 = arith.constant 0 : index
    %11 = vector.load %arg4[%c0_9, %c0_10] : memref<1x3xf32, #tpu.memory_space<vmem>>, vector<1x3xf32>
    %12 = vector.broadcast %11 : vector<1x3xf32> to vector<8x3xf32>
    %13 = arith.addf %10, %12 : vector<8x3xf32>
    %14 = arith.negf %13 : vector<8x3xf32>
    %15 = math.exp %14 : vector<8x3xf32>
    %cst_11 = arith.constant 1.000000e+00 : f32
    %16 = vector.broadcast %cst_11 : f32 to vector<8x3xf32>
    %17 = arith.addf %16, %15 : vector<8x3xf32>
    %18 = arith.divf %16, %17 : vector<8x3xf32>
    %19 = vector.extract_strided_slice %18 {offsets = [0, 2], sizes = [8, 1], strides = [1, 1]} : vector<8x3xf32> to vector<8x1xf32>
    %c0_12 = arith.constant 0 : index
    %c0_13 = arith.constant 0 : index
    %20 = vector.load %arg5[%c0_12, %c0_13] : memref<8x1xi32, #tpu.memory_space<vmem>>, vector<8x1xi32>
    %c0_14 = arith.constant 0 : index
    %c0_15 = arith.constant 0 : index
    %21 = vector.load %arg6[%c0_14, %c0_15] : memref<8x1xi32, #tpu.memory_space<vmem>>, vector<8x1xi32>
    %22 = vector.extract_strided_slice %18 {offsets = [0, 0], sizes = [8, 1], strides = [1, 1]} : vector<8x3xf32> to vector<8x1xf32>
    %23 = vector.extract_strided_slice %18 {offsets = [0, 1], sizes = [8, 1], strides = [1, 1]} : vector<8x3xf32> to vector<8x1xf32>
    %c0_i32 = arith.constant 0 : i32
    %24 = vector.broadcast %c0_i32 : i32 to vector<8x1xi32>
    %25 = arith.cmpi eq, %20, %24 : vector<8x1xi32>
    %26 = arith.select %25, %22, %23 : vector<8x1xi1>, vector<8x1xf32>
    %c0_i32_16 = arith.constant 0 : i32
    %27 = vector.broadcast %c0_i32_16 : i32 to vector<8x1xi32>
    %28 = arith.cmpi eq, %21, %27 : vector<8x1xi32>
    %29 = arith.select %28, %22, %23 : vector<8x1xi1>, vector<8x1xf32>
    %30 = tpu.iota {dimensions = array<i32: 1>} : vector<8x3xi32>
    %c0_i32_17 = arith.constant 0 : i32
    %31 = vector.broadcast %c0_i32_17 : i32 to vector<8x3xi32>
    %32 = arith.cmpi eq, %30, %31 : vector<8x3xi32>
    %c1_i32 = arith.constant 1 : i32
    %33 = vector.broadcast %c1_i32 : i32 to vector<8x3xi32>
    %34 = arith.cmpi eq, %30, %33 : vector<8x3xi32>
    %35 = vector.shape_cast %26 : vector<8x1xf32> to vector<8x1xf32>
    %36 = vector.broadcast %35 : vector<8x1xf32> to vector<8x3xf32>
    %37 = vector.shape_cast %29 : vector<8x1xf32> to vector<8x1xf32>
    %38 = vector.broadcast %37 : vector<8x1xf32> to vector<8x3xf32>
    %39 = arith.select %34, %36, %38 : vector<8x3xi1>, vector<8x3xf32>
    %40 = vector.shape_cast %19 : vector<8x1xf32> to vector<8x1xf32>
    %41 = vector.broadcast %40 : vector<8x1xf32> to vector<8x3xf32>
    %42 = arith.select %32, %41, %39 : vector<8x3xi1>, vector<8x3xf32>
    %c0_18 = arith.constant 0 : index
    %c0_19 = arith.constant 0 : index
    %43 = vector.load %arg7[%c0_18, %c0_19] : memref<8x3xf32, #tpu.memory_space<vmem>>, vector<8x3xf32>
    tpu.vector_store %arg7[%c0_18, %c0_19], %42 {strides = array<i32>} : memref<8x3xf32, #tpu.memory_space<vmem>>, vector<8x3xf32>,
    return
  }
}

</mosaic_0001>

<bundles_post_ra>
// kernel: fair_classifier_forward.1
= control target key start
LH: loop header
LB: loop body
LE: loop exit
PB: predicated region body
PF: predicated region fallthrough
CT: control target
= control target key end

     0   :  { %vm1100_vm0 = vmmov 0   ;;  %vm734_vm1 = vcmask 261120   ;;  %s1102_s15 = smov 127   ;;  %vm844_vm6 = vcmask 23552   ;;  %s1387_s1 = inlined_call_operand.vmem [shape: bf16[1024,32], index: 1, kind: input, shape index: {}]   ;;  %s1388_s0 = inlined_call_operand.vmem [shape: f32[8,1024], index: 0, kind: input, shape index: {}]   ;;  %s1389_s3 = inlined_call_operand.vmem [shape: f32[32,3], index: 3, kind: input, shape index: {}]   ;;  %s1390_s2 = inlined_call_operand.vmem [shape: f32[1,32], index: 2, kind: input, shape index: {}]   ;;  %s1391_s4 = inlined_call_operand.vmem [shape: f32[1,3], index: 4, kind: input, shape index: {}]   ;;  %s1392_s6 = inlined_call_operand.vmem [shape: s32[8,1], index: 6, kind: input, shape index: {}]   ;;  %s1393_s5 = inlined_call_operand.vmem [shape: s32[8,1], index: 5, kind: input, shape index: {}]   ;;  %s1394_s7 = inlined_call_operand.vmem [shape: f32[8,3], index: 7, kind: output, shape index: {}]  }
   0x1   :  { %v1031_v0 = vld [vmem:[%s1387_s1 + $0x78] sm:$0xff]   ;;  %v1035_v4 = vld [vmem:[%s1387_s1 + $0x70] sm:$0xff]   ;;  %v1039_v8 = vld [vmem:[%s1387_s1 + $0x68] sm:$0xff]  }
   0x2   :  { %v1032_v1 = vld [vmem:[%s1387_s1 + $0xf8] sm:$0xff]   ;;  %918 = vmatprep.subr.bf16.mxu0 %v1031_v0  ;;  %v1036_v5 = vld [vmem:[%s1387_s1 + $0xf0] sm:$0xff]   ;;  %v1040_v9 = vld [vmem:[%s1387_s1 + $0xe8] sm:$0xff]  }
   0x3   :  { %v1033_v2 = vld [vmem:[%s1387_s1 + $0x38] sm:$0xff]   ;;  %940 = vmatprep.subr.bf16.mxu1 %v1032_v1  ;;  %v1037_v6 = vld [vmem:[%s1387_s1 + $0x30] sm:$0xff]   ;;  %v1041_v10 = vld [vmem:[%s1387_s1 + $0x28] sm:$0xff]  }
   0x4   :  { %v1034_v3 = vld [vmem:[%s1387_s1 + $0xb8] sm:$0xff]   ;;  %919 = vmatpush3.bf16.msra.mxu0 %v1033_v2  ;;  %v1038_v7 = vld [vmem:[%s1387_s1 + $0xb0] sm:$0xff]   ;;  %v1042_v11 = vld [vmem:[%s1387_s1 + $0xa8] sm:$0xff]  }
   0x5   :  { %941 = vmatpush3.bf16.msra.mxu1 %v1034_v3  ;;  %920 = vmatprep.subr.bf16.mxu0 %v1035_v4  ;;  %v1043_v12 = vld [vmem:[%s1387_s1 + $0x60] sm:$0xff]   ;;  %v1047_v16 = vld [vmem:[%s1387_s1 + $0x58] sm:$0xff]   ;;  %v1051_v20 = vld [vmem:[%s1387_s1 + $0x50] sm:$0xff]  }
   0x6   :  { %942 = vmatprep.subr.bf16.mxu1 %v1036_v5  ;;  %v1044_v13 = vld [vmem:[%s1387_s1 + $0xe0] sm:$0xff]   ;;  %v1048_v17 = vld [vmem:[%s1387_s1 + $0xd8] sm:$0xff]   ;;  %v1052_v21 = vld [vmem:[%s1387_s1 + $0xd0] sm:$0xff]  }
   0x7   :  { %v1045_v14 = vld [vmem:[%s1387_s1 + $0x20] sm:$0xff]   ;;  %v1049_v18 = vld [vmem:[%s1387_s1 + $0x18] sm:$0xff]   ;;  %v1053_v22 = vld [vmem:[%s1387_s1 + $0x10] sm:$0xff]  }
   0x8   :  { %921 = vmatpush3.bf16.msra.mxu0 %v1037_v6  ;;  %v1046_v15 = vld [vmem:[%s1387_s1 + $0xa0] sm:$0xff]   ;;  %v1050_v19 = vld [vmem:[%s1387_s1 + $0x98] sm:$0xff]   ;;  %v1054_v23 = vld [vmem:[%s1387_s1 + $0x90] sm:$0xff]  }
   0x9   :  { %943 = vmatpush3.bf16.msra.mxu1 %v1038_v7  ;;  %922 = vmatprep.subr.bf16.mxu0 %v1039_v8  ;;  %v1055_v24 = vld [vmem:[%s1387_s1 + $0x48] sm:$0xff]   ;;  %v1059_v28 = vld [vmem:[%s1387_s1 + $0x40] sm:$0xff]   ;;  %v30_v33 = vld [vmem:[%s1388_s0 + $0x18] sm:$0xff] }
   0xa   :  { %944 = vmatprep.subr.bf16.mxu1 %v1040_v9  ;;  %v1056_v25 = vld [vmem:[%s1387_s1 + $0xc8] sm:$0xff]   ;;  %v1060_v29 = vld [vmem:[%s1387_s1 + $0xc0] sm:$0xff]   ;;  %v38_v36 = vpack.c.bf16 %v30_v33, %v30_v33  ;;  %v29_v38 = vld [vmem:[%s1388_s0 + $0x10] sm:$0xff] }
   0xb   :  { %v1057_v26 = vld [vmem:[%s1387_s1 + $0x8] sm:$0xff]   ;;  %v1061_v30 = vld [vmem:[%s1387_s1] sm:$0xff]   ;;  %v37_v39 = vpack.c.bf16 %v29_v38, %v29_v38  ;;  %v1063_v40 = vld [vmem:[%s1387_s1 + $0x178] sm:$0xff]  }
   0xc   :  { %923 = vmatpush3.bf16.msra.mxu0 %v1041_v10  ;;  %v1058_v27 = vld [vmem:[%s1387_s1 + $0x88] sm:$0xff]   ;;  %v1062_v31 = vld [vmem:[%s1387_s1 + $0x80] sm:$0xff]   ;;  %634 = vmatprep.mubr.bf16.mxu1 %v38_v36  ;;  %v1064_v41 = vld [vmem:[%s1387_s1 + $0x1f8] sm:$0xff]  }
   0xd   :  { %945 = vmatpush3.bf16.msra.mxu1 %v1042_v11  ;;  %924 = vmatprep.subr.bf16.mxu0 %v1043_v12  ;;  %v28_v32 = vld [vmem:[%s1388_s0 + $0x8] sm:$0xff]  ;;  %v27_v34 = vld [vmem:[%s1388_s0] sm:$0xff]  ;;  %v1065_v42 = vld [vmem:[%s1387_s1 + $0x138] sm:$0xff]  }
   0xe   :  { %946 = vmatprep.subr.bf16.mxu1 %v1044_v13  ;;  %v36_v35 = vpack.c.bf16 %v28_v32, %v28_v32  ;;  %v35_v37 = vpack.c.bf16 %v27_v34, %v27_v34  ;;  %v1066_v43 = vld [vmem:[%s1387_s1 + $0x1b8] sm:$0xff]   ;;  %v1067_v44 = vld [vmem:[%s1387_s1 + $0x170] sm:$0xff]   ;;  %v1071_v48 = vld [vmem:[%s1387_s1 + $0x168] sm:$0xff]  }
   0xf   :  { %v1068_v45 = vld [vmem:[%s1387_s1 + $0x1f0] sm:$0xff]   ;;  %v1072_v49 = vld [vmem:[%s1387_s1 + $0x1e8] sm:$0xff]   ;;  %v1075_v52 = vld [vmem:[%s1387_s1 + $0x160] sm:$0xff]  }
  0x10   :  { %925 = vmatpush3.bf16.msra.mxu0 %v1045_v14  ;;  %594 = vmatprep.mubr.bf16.mxu0 %v36_v35  ;;  %v1069_v46 = vld [vmem:[%s1387_s1 + $0x130] sm:$0xff]   ;;  %v1073_v50 = vld [vmem:[%s1387_s1 + $0x128] sm:$0xff]   ;;  %v1076_v53 = vld [vmem:[%s1387_s1 + $0x1e0] sm:$0xff]  }
  0x11   :  { %947 = vmatpush3.bf16.msra.mxu1 %v1046_v15  ;;  %926 = vmatprep.subr.bf16.mxu0 %v1047_v16  ;;  %v1070_v47 = vld [vmem:[%s1387_s1 + $0x1b0] sm:$0xff]   ;;  %v1074_v51 = vld [vmem:[%s1387_s1 + $0x1a8] sm:$0xff]   ;;  %v1077_v54 = vld [vmem:[%s1387_s1 + $0x120] sm:$0xff]   ;;  %v1099_v16 = vmov 0.0  }
  0x12   :  { %948 = vmatprep.subr.bf16.mxu1 %v1048_v17  ;;  %v1078_v55 = vld [vmem:[%s1387_s1 + $0x1a0] sm:$0xff]   ;;  %v1079_v56 = vld [vmem:[%s1387_s1 + $0x158] sm:$0xff]   ;;  %v1083_v60 = vld [vmem:[%s1387_s1 + $0x150] sm:$0xff]  }
  0x13   :  { %v1080_v57 = vld [vmem:[%s1387_s1 + $0x1d8] sm:$0xff]   ;;  %v1084_v61 = vld [vmem:[%s1387_s1 + $0x1d0] sm:$0xff]   ;;  %v1087_v0 = vld [vmem:[%s1387_s1 + $0x148] sm:$0xff]  }
  0x14   :  { %927 = vmatpush3.bf16.msra.mxu0 %v1049_v18  ;;  %v1081_v58 = vld [vmem:[%s1387_s1 + $0x118] sm:$0xff]   ;;  %v1085_v62 = vld [vmem:[%s1387_s1 + $0x110] sm:$0xff]   ;;  %v1088_v1 = vld [vmem:[%s1387_s1 + $0x1c8] sm:$0xff]  }
  0x15   :  { %949 = vmatpush3.bf16.msra.mxu1 %v1050_v19  ;;  %928 = vmatprep.subr.bf16.mxu0 %v1051_v20  ;;  %v1082_v59 = vld [vmem:[%s1387_s1 + $0x198] sm:$0xff]   ;;  %v1086_v63 = vld [vmem:[%s1387_s1 + $0x190] sm:$0xff]   ;;  %v1089_v2 = vld [vmem:[%s1387_s1 + $0x108] sm:$0xff]  }
  0x16   :  { %950 = vmatprep.subr.bf16.mxu1 %v1052_v21  ;;  %v1090_v3 = vld [vmem:[%s1387_s1 + $0x188] sm:$0xff]   ;;  %v1091_v4 = vld [vmem:[%s1387_s1 + $0x140] sm:$0xff]   ;;  %v34_v9 = vld [vmem:[%s1388_s0 + $0x38] sm:$0xff] }
  0x17   :  { %v1092_v5 = vld [vmem:[%s1387_s1 + $0x1c0] sm:$0xff]   ;;  %v32_v8 = vld [vmem:[%s1388_s0 + $0x28] sm:$0xff]  ;;  %v42_v11 = vpack.c.bf16 %v34_v9, %v34_v9  ;;  %v33_v13 = vld [vmem:[%s1388_s0 + $0x30] sm:$0xff] }
  0x18   :  { %929 = vmatpush3.bf16.msra.mxu0 %v1053_v22  ;;  %v1093_v6 = vld [vmem:[%s1387_s1 + $0x100] sm:$0xff]   ;;  %v40_v10 = vpack.c.bf16 %v32_v8, %v32_v8  ;;  %v41_v15 = vpack.c.bf16 %v33_v13, %v33_v13  ;;  %v726_v17 = vld [vmem:[%s1389_s3 + $0x18] sm:$0xff]  ;;  %v725_v18 = vld [vmem:[%s1389_s3 + $0x10] sm:$0xff] }
  0x19   :  { %951 = vmatpush3.bf16.msra.mxu1 %v1054_v23  ;;  %930 = vmatprep.subr.bf16.mxu0 %v1055_v24  ;;  %v1094_v7 = vld [vmem:[%s1387_s1 + $0x180] sm:$0xff]   ;;  %v724_v19 = vld [vmem:[%s1389_s3 + $0x8] sm:$0xff] }
  0x1a   :  { %952 = vmatprep.subr.bf16.mxu1 %v1056_v25  ;;  %v31_v12 = vld [vmem:[%s1388_s0 + $0x20] sm:$0xff] }
  0x1b   :  { %v39_v14 = vpack.c.bf16 %v31_v12, %v31_v12  ;;  %v723_v20 = vld [vmem:[%s1389_s3] sm:$0xff] }
  0x1c   :  { %931 = vmatpush3.bf16.msra.mxu0 %v1057_v26 }
  0x1d   :  { %953 = vmatpush3.bf16.msra.mxu1 %v1058_v27  ;;  %932 = vmatprep.subr.bf16.mxu0 %v1059_v28 }
  0x1e   :  { %954 = vmatprep.subr.bf16.mxu1 %v1060_v29 }
  0x20   :  { %933 = vmatpush3.bf16.msra.mxu0 %v1061_v30  ;;  %v850_v30 = vld [vmem:[%s1390_s2] ss:$0 sm:$0xff] }
  0x21   :  { %955 = vmatpush3.bf16.msra.mxu1 %v1062_v31  ;;  %962 = vmatprep.subr.bf16.mxu0 %v1063_v40 }
  0x22   :  { %984 = vmatprep.subr.bf16.mxu1 %v1064_v41 }
  0x23   :  { %595 = vmatmul.mubr.bf16.vlgmr.msra.gmra.mxu0 %v35_v37 }
  0x24   :  { %635 = vmatmul.mubr.bf16.vlgmr.msra.gmra.mxu1 %v37_v39  ;;  %963 = vmatpush3.bf16.msra.mxu0 %v1065_v42 }
  0x25   :  { %985 = vmatpush3.bf16.msra.mxu1 %v1066_v43  ;;  %964 = vmatprep.subr.bf16.mxu0 %v1067_v44 }
  0x26   :  { %986 = vmatprep.subr.bf16.mxu1 %v1068_v45  ;;  %674 = vmatprep.mubr.bf16.mxu0 %v40_v10 }
  0x27   :  { %714 = vmatprep.mubr.bf16.mxu1 %v42_v11 }
  0x28   :  { %965 = vmatpush3.bf16.msra.mxu0 %v1069_v46 }
  0x29   :  { %987 = vmatpush3.bf16.msra.mxu1 %v1070_v47  ;;  %966 = vmatprep.subr.bf16.mxu0 %v1071_v48  ;;  %v915_v47 = vld [vmem:[%s1391_s4] ss:$0 sm:$0xff] }
  0x2a   :  { %988 = vmatprep.subr.bf16.mxu1 %v1072_v49 }
  0x2c   :  { %967 = vmatpush3.bf16.msra.mxu0 %v1073_v50 }
  0x2d   :  { %989 = vmatpush3.bf16.msra.mxu1 %v1074_v51  ;;  %968 = vmatprep.subr.bf16.mxu0 %v1075_v52 }
  0x2e   :  { %990 = vmatprep.subr.bf16.mxu1 %v1076_v53 }
  0x30   :  { %969 = vmatpush3.bf16.msra.mxu0 %v1077_v54  ;;  %v1101_v54 = vmov 0  }
  0x31   :  { %991 = vmatpush3.bf16.msra.mxu1 %v1078_v55  ;;  %970 = vmatprep.subr.bf16.mxu0 %v1079_v56  ;;  %v815_v56 = vld [vmem:[%s1392_s6] sm:$0xff] }
  0x32   :  { %992 = vmatprep.subr.bf16.mxu1 %v1080_v57  ;;  %1028 = vset.pattern.permute.xlu1 %v1101_v54  ;;  %v814_v57 = vld [vmem:[%s1393_s5] sm:$0xff]  ;;  %vm822_vm2 = vcmp.eq.s32.totalorder %v815_v56, 0 }
  0x33   :  { %1027 = vset.pattern.permute.xlu0 %v1101_v54  ;;  %vm816_vm3 = vcmp.eq.s32.totalorder %v814_v57, 0 }
  0x34   :  { %971 = vmatpush3.bf16.msra.mxu0 %v1081_v58 }
  0x35   :  { %993 = vmatpush3.bf16.msra.mxu1 %v1082_v59  ;;  %972 = vmatprep.subr.bf16.mxu0 %v1083_v60 }
  0x36   :  { %994 = vmatprep.subr.bf16.mxu1 %v1084_v61  ;;  %v1103_v61 = vmov 2  }
  0x38   :  { %973 = vmatpush3.bf16.msra.mxu0 %v1085_v62  ;;  %v824_v62 = vlaneseq }
  0x39   :  { %995 = vmatpush3.bf16.msra.mxu1 %v1086_v63  ;;  %974 = vmatprep.subr.bf16.mxu0 %v1087_v0 }
  0x3a   :  { %996 = vmatprep.subr.bf16.mxu1 %v1088_v1  ;;  %v825_v63 = vand.u32 127, %v824_v62 }
  0x3c   :  { %975 = vmatpush3.bf16.msra.mxu0 %v1089_v2  ;;  %vm827_vm4 = vcmp.eq.s32.totalorder %v825_v63, 1  ;;  %vm826_vm5 = vcmp.eq.s32.totalorder %v825_v63, 0 }
  0x3d   :  { %997 = vmatpush3.bf16.msra.mxu1 %v1090_v3  ;;  %976 = vmatprep.subr.bf16.mxu0 %v1091_v4 }
  0x3e   :  { %998 = vmatprep.subr.bf16.mxu1 %v1092_v5 }
  0x40   :  { %977 = vmatpush3.bf16.msra.mxu0 %v1093_v6 }
  0x41   :  { %999 = vmatpush3.bf16.msra.mxu1 %v1094_v7  ;;  %1011 = vmatprep.subr.mxu0 %v1099_v16 }
  0x43   :  { %675 = vmatmul.mubr.bf16.vlgmr.msra.gmra.mxu0 %v39_v14 }
  0x44   :  { %715 = vmatmul.mubr.bf16.vlgmr.msra.gmra.mxu1 %v41_v15  ;;  %1012 = vmatpush3.msra.mxu0 %v726_v17 }
  0x45   :  { %1013 = vmatprep.subr.mxu0 %v1099_v16  ;;  %1019 = vmatprep.mubr.msk.f32.mxu0 %vm1100_vm0, %v1099_v16 }
  0x46   :  { %1014 = vmatpush3.msra.mxu0 %v725_v18 }
  0x47   :  { %1015 = vmatprep.subr.mxu0 %v1099_v16 }
  0x48   :  { %1016 = vmatpush3.msra.mxu0 %v724_v19 }
  0x49   :  { %1017 = vmatprep.subr.mxu0 %v1099_v16 }
  0x4a   :  { %1018 = vmatpush3.msra.mxu0 %v723_v20 }
  0xe3   :  { %v934_v21 = vpop.f32.mrf.mxu0 }
  0xe4   :  { %v956_v22 = vpop.f32.mrf.mxu1 }
  0xe5   :  { %v935_v23 = vpop.f32.mrf.mxu0 }
  0xe6   :  { %v957_v24 = vpop.f32.mrf.mxu1  ;;  %v936_v29 = vadd.f32 %v935_v23, %v934_v21 }
  0xe7   :  { %v937_v25 = vpop.f32.mrf.mxu0  ;;  %v958_v32 = vadd.f32 %v957_v24, %v956_v22 }
  0xe8   :  { %v959_v26 = vpop.f32.mrf.mxu1  ;;  %v597_v31 = vadd.f32 %v936_v29, %v850_v30 }
  0xe9   :  { %v938_v27 = vpop.f32.mrf.mxu0 }
  0xea   :  { %v960_v28 = vpop.f32.mrf.mxu1  ;;  %v637_v36 = vadd.f32 %v958_v32, %v597_v31 }
 0x103   :  { %v978_v33 = vpop.f32.mrf.mxu0 }
 0x104   :  { %v1000_v34 = vpop.f32.mrf.mxu1 }
 0x105   :  { %v979_v35 = vpop.f32.mrf.mxu0 }
 0x106   :  { %v980_v37 = vadd.f32 %v979_v35, %v978_v33  ;;  %v1001_v38 = vpop.f32.mrf.mxu1 }
 0x107   :  { %v981_v39 = vpop.f32.mrf.mxu0  ;;  %v1002_v41 = vadd.f32 %v1001_v38, %v1000_v34 }
 0x108   :  { %v677_v40 = vadd.f32 %v980_v37, %v637_v36  ;;  %v1003_v42 = vpop.f32.mrf.mxu1 }
 0x109   :  { %v982_v43 = vpop.f32.mrf.mxu0 }
 0x10a   :  { %v717_v44 = vadd.f32 %v1002_v41, %v677_v40  ;;  %v1004_v45 = vpop.f32.mrf.mxu1 }
 0x10c   :  { %v722_v46 = vmax.f32 %v717_v44, 0.0 }
 0x10e   :  { %1020 = vmatmul.mubr.msk.f32.vlgmr.msra.gmra.mxu0 %vm734_vm1, %v722_v46 }
 0x1ce   :  { %v804_v48 = vpop.f32.mrf.mxu0 }
 0x1cf   :  { %v805_v49 = vadd.f32 %v915_v47, %v804_v48 }
 0x1d0   :  { %v1021_v50 = vpop.f32.mrf.mxu0 }
 0x1d1   :  { %v917_v51 = vmul.f32 -1.442695, %v805_v49 }
 0x1d3   :  { %1095 = vpow2.f32 %v917_v51 }
 0x1e0   :  { %v1096_v52 = vpop.eup %1095 }
 0x1e1   :  { %v811_v53 = vadd.f32 1.0, %v1096_v52 }
 0x1e3   :  { %1097 = vrcp.f32 %v811_v53 }
 0x1f0   :  { %v1098_v55 = vpop.eup %1097 }
 0x1f1   :  { %818 = vrot.lane.b32.xlu0 %v1098_v55, %s1102_s15 }
 0x263   :  { %v819_v58 = vpop.permute.xlu0 %818 }
 0x264   :  { %v823_v59 = vsel %vm822_vm2, %v1098_v55, %v819_v58  ;;  %v821_v60 = vsel %vm816_vm3, %v1098_v55, %v819_v58 }
 0x265   :  { %835 = vperm.xlu1 %1028, %v823_v59   ;;  %830 = vperm.xlu0 %1027, %v821_v60  }
 0x269   :  { %1029 = vset.pattern.permute.xlu1 %v1103_v61  ;;  %1030 = vset.pattern.permute.xlu0 %v1103_v61 }
 0x26a   :  { %840 = vperm.xlu1 %1029, %v1098_v55  }
 0x2e0   :  { %v836_v0 = vpop.permute.xlu1 %835  ;;  %v831_v1 = vpop.permute.xlu0 %830 }
 0x2e1   :  { %v838_v2 = vsel %vm827_vm4, %v831_v1, %v836_v0 }
 0x2e5   :  { %v841_v3 = vpop.permute.xlu1 %840 }
 0x2e6   :  { %v843_v4 = vsel %vm826_vm5, %v841_v3, %v838_v2 }
 0x2e7   :  { %845 = vst.msk [vmem:[%s1394_s7] sm:$0xff] %vm844_vm6, %v843_v4 }

</bundles_post_ra>
